<compile_context>
chip_gen: v7x
topology: tpu7x:2x2x1
jax: 0.10.0
libtpu: 0.0.40
codegen_flags: <defaults>
</compile_context>

<pallas_src>
import jax
import jax.numpy as jnp
from jax.experimental import pallas as pl
from jax.experimental.pallas import tpu as pltpu

_LANES = 128
_SUBLANES = 8
_ROW = _SUBLANES * _LANES          # 1024 elements = one full f32 vreg
_ROW_TILE = 256                    # 256 rows * 1024 * 4 B = 1 MiB f32 per block
_LANE_TILE = 64 * 1024             # fallback path: 256 KiB f32 per block


def _make_sigmoid_kernel(compute_dtype):
    def kernel(x_ref, o_ref):
        x = x_ref[...].astype(compute_dtype)
        # sigmoid(x) = 0.5 * (1 + tanh(x/2)): single EUP tanh, no exact divide.
        y = 0.5 * (1.0 + jnp.tanh(0.5 * x))
        o_ref[...] = y.astype(o_ref.dtype)
    return kernel


def sigmoid_pallas(x):
    """Elementwise sigmoid via a Pallas TPU kernel (no pad, no slice)."""
    if not jnp.issubdtype(x.dtype, jnp.floating):
        raise TypeError(f"sigmoid_pallas expects a floating dtype, got {x.dtype}")

    orig_shape = x.shape
    n = x.size
    if n == 0:
        return x

    # bf16 computes natively on v6e/v7x; everything else goes through f32.
    compute_dtype = x.dtype if x.dtype == jnp.bfloat16 else jnp.float32
    kernel = _make_sigmoid_kernel(compute_dtype)

    compiler_params = pltpu.CompilerParams(dimension_semantics=("parallel",))
    cost = pl.CostEstimate(
        flops=3 * n,
        transcendentals=n,
        bytes_accessed=2 * n * x.dtype.itemsize,
    )

    if n % _ROW == 0:
        # Preferred layout: (rows, 1024).  Every block is one contiguous DMA
        # and every vreg is fully packed (8 sublanes x 128 lanes).
        rows = n // _ROW
        arr = x.reshape(rows, _ROW)
        row_tile = min(rows, _ROW_TILE)       # full-array block if it fits
        grid = (pl.cdiv(rows, row_tile),)
        block = (row_tile, _ROW)
        index_map = lambda i: (i, 0)
    else:
        # Fallback for non-multiple-of-1024 sizes (e.g. the 2064-element case):
        # a lane-major (1, n) slab.  Small sizes use a single full-array block;
        # larger ones tile along lanes, with the edge block masked by Pallas.
        arr = x.reshape(1, n)
        lane_tile = n if n <= _LANE_TILE else _LANE_TILE
        grid = (pl.cdiv(n, lane_tile),)
        block = (1, lane_tile)
        index_map = lambda i: (0, i)

    out = pl.pallas_call(
        kernel,
        out_shape=jax.ShapeDtypeStruct(arr.shape, arr.dtype),
        grid=grid,
        in_specs=[pl.BlockSpec(block, index_map)],
        out_specs=pl.BlockSpec(block, index_map),
        input_output_aliases={0: 0},
        compiler_params=compiler_params,
        cost_estimate=cost,
    )(arr)

    return out.reshape(orig_shape)


class M:
    """JAX/Pallas equivalent of the PyTorch module M (pure sigmoid, no params)."""

    def __call__(self, x571):
        return sigmoid_pallas(x571)


if __name__ == "__main__":
    key = jax.random.PRNGKey(0)
    m = M()

    # Same shape as the PyTorch reference: (N=1, C=2064, H=1, W=1), float32.
    x571 = jax.random.normal(key, (1, 2064, 1, 1), dtype=jnp.float32)
    y = jax.block_until_ready(m(x571))
    ref = jax.nn.sigmoid(x571)
    assert y.shape == x571.shape and y.dtype == x571.dtype
    assert jnp.allclose(y, ref, atol=1e-5, rtol=1e-5)

    # Secondary check: exercise the tiled (rows, 1024) grid path (2 blocks).
    x_big = jax.random.normal(jax.random.PRNGKey(1), (8, 256, 16, 16),
                              dtype=jnp.float32)
    y_big = jax.block_until_ready(m(x_big))
    assert jnp.allclose(y_big, jax.nn.sigmoid(x_big), atol=1e-5, rtol=1e-5)

    print("KERNEL_OK")
</pallas_src>

<mosaic_0001>
module attributes {stable_mosaic.version = 11 : i64} {
  func.func @kernel(%arg0: i32, %arg1: memref<1x2064xf32, #tpu.memory_space<vmem>>, %arg2: memref<1x2064xf32, #tpu.memory_space<vmem>>) attributes {dimension_semantics = [#tpu.dimension_semantics<parallel>], iteration_bounds = array<i64: 1>, scalar_prefetch = 0 : i64, scratch_operands = 0 : i64, tpu.core_type = #tpu.core_type<tc>, window_params = [{transform_indices = @transform_0, window_bounds = array<i64: 1, 2064>}, {transform_indices = @transform_1, window_bounds = array<i64: 1, 2064>}]} {
    %c0 = arith.constant 0 : index
    %c0_0 = arith.constant 0 : index
    %0 = vector.load %arg1[%c0, %c0_0] : memref<1x2064xf32, #tpu.memory_space<vmem>>, vector<1x2064xf32>
    %cst = arith.constant 5.000000e-01 : f32
    %1 = vector.broadcast %cst : f32 to vector<1x2064xf32>
    %2 = arith.mulf %1, %0 : vector<1x2064xf32>
    %3 = math.tanh %2 : vector<1x2064xf32>
    %cst_1 = arith.constant 1.000000e+00 : f32
    %4 = vector.broadcast %cst_1 : f32 to vector<1x2064xf32>
    %5 = arith.addf %4, %3 : vector<1x2064xf32>
    %cst_2 = arith.constant 5.000000e-01 : f32
    %6 = vector.broadcast %cst_2 : f32 to vector<1x2064xf32>
    %7 = arith.mulf %6, %5 : vector<1x2064xf32>
    %c0_3 = arith.constant 0 : index
    %c0_4 = arith.constant 0 : index
    %8 = vector.load %arg2[%c0_3, %c0_4] : memref<1x2064xf32, #tpu.memory_space<vmem>>, vector<1x2064xf32>
    tpu.vector_store %arg2[%c0_3, %c0_4], %7 {strides = array<i32>} : memref<1x2064xf32, #tpu.memory_space<vmem>>, vector<1x2064xf32>,
    return
  }
  func.func @transform_0(%arg0: i32) -> (i32, i32) {
    %c0_i32 = arith.constant 0 : i32
    %c0_i32_0 = arith.constant 0 : i32
    return %c0_i32, %arg0 : i32, i32
  }
  func.func @transform_1(%arg0: i32) -> (i32, i32) {
    %c0_i32 = arith.constant 0 : i32
    %c0_i32_0 = arith.constant 0 : i32
    return %c0_i32, %arg0 : i32, i32
  }
}

</mosaic_0001>

<bundles_post_ra>
// kernel: tpu_custom_call.1
= control target key start
LH: loop header
LB: loop body
LE: loop exit
PB: predicated region body
PF: predicated region fallthrough
CT: control target
= control target key end

     0   :  { %6 = vsyncpa [#allocation3], 0  ;;  %s150_s0 = inlined_call_operand.hbm [shape: f32[1,2064], index: 0, kind: input, shape index: {}, may-alias: {0,1}]   ;;  %s151_s1 = inlined_call_operand.hbm [shape: f32[1,2064], index: 1, kind: output, shape index: {}, may-alias: {0,1}]  }
   0x1   :  { %7 = vsyncpa [#allocation4], 0  ;;  %s114_s6 = smov [#allocation2]   ;;  %s66_s10 = scalar_lea.hbm %s150_s0, 272 }
   0x2   :  { %s14_s7 = sshll.u32 %s114_s6, 4  ;;  %p67_p0 = scmp.ne.s32.totalorder %s150_s0, %s66_s10  ;;  %s15_s7 = int_to_ptr.vmem [resolvable:$true] %s14_s7 }
   0x3   :  { %p70_p1 = scmp.lt.u32.totalorder %s66_s10, %s150_s0 }
   0x5   :  { %p72_p2 = pnand %p70_p1, %p67_p0 }
   0x7   :  { %75 = shalt.err (!%p72_p2)
}
   0x8   :  { %s76_s15 = scalar_lea.vmem %s15_s7, 272  ;;  %s80_s16 = scalar_lea.vmem %s15_s7, 288 }
   0x9   :  { %p77_p3 = scmp.ne.s32.totalorder %s15_s7, %s76_s15  ;;  %p81_p4 = scmp.lt.s32.totalorder %s15_s7, %s15_s7 }
   0xa   :  { %p82_p5 = scmp.lt.s32.totalorder %s80_s16, %s76_s15 }
   0xc   :  { %p83_p6 = por %p82_p5, %p81_p4 }
   0xe   :  { %p84_p7 = pnand %p83_p6, %p77_p3 }
  0x10   :  { %87 = shalt.err (!%p84_p7)
}
  0x11   :  { %17 = dma.hbm_to_vmem [thread:$0]  %s150_s0, 272, %s15_s7, [#allocation3]  }
  0x12   :  { %110 = dma.done.wait [#allocation3], 272  }
  0x13   :  { %111 = vsyncadd [#allocation3], 4294967024  ;;  %v21_v0 = vld [vmem:[#allocation2] sm:$0xff]  ;;  %v22_v1 = vld [vmem:[#allocation2 + $0x8] sm:$0xff]  ;;  %v38_v7 = vlaneseq  ;;  %s115_s19 = smov [#allocation5]  }
  0x14   :  { %v23_v2 = vld [vmem:[#allocation2 + $0x10] sm:$0x1]  ;;  %v24_v3 = vmul.f32 0.5, %v21_v0  ;;  %v25_v4 = vmul.f32 0.5, %v22_v1  ;;  %s49_s20 = sshll.u32 %s115_s19, 4  ;;  %s50_s20 = int_to_ptr.vmem [resolvable:$true] %s49_s20 }
  0x15   :  { %v26_v5 = vmul.f32 0.5, %v23_v2  ;;  %vm40_vm0 = vcmp.lt.s32.totalorder %v38_v7, 16  ;;  %s88_s0 = scalar_lea.vmem %s50_s20, 272  ;;  %s92_s21 = scalar_lea.vmem %s50_s20, 288 }
  0x16   :  { %60 = vtanh.f32 %v24_v3  ;;  %p89_p8 = scmp.ne.s32.totalorder %s50_s20, %s88_s0  ;;  %p93_p9 = scmp.lt.s32.totalorder %s50_s20, %s50_s20 }
  0x17   :  { %62 = vtanh.f32 %v25_v4  ;;  %p94_p10 = scmp.lt.s32.totalorder %s92_s21, %s88_s0 }
  0x18   :  { %64 = vtanh.f32 %v26_v5 }
  0x19   :  { %p95_p11 = por %p94_p10, %p93_p9 }
  0x1b   :  { %p96_p12 = pnand %p95_p11, %p89_p8 }
  0x20   :  { %v61_v6 = vpop.eup %60 }
  0x21   :  { %v63_v8 = vpop.eup %62  ;;  %v30_v9 = vadd.f32 1.0, %v61_v6 }
  0x22   :  { %v65_v10 = vpop.eup %64  ;;  %v31_v11 = vadd.f32 1.0, %v63_v8 }
  0x23   :  { %v33_v12 = vmul.f32 0.5, %v30_v9  ;;  %v32_v13 = vadd.f32 1.0, %v65_v10 }
  0x24   :  { %v34_v14 = vmul.f32 0.5, %v31_v11 }
  0x25   :  { %36 = vst [vmem:[#allocation5] sm:$0xff] %v33_v12  ;;  %v35_v15 = vmul.f32 0.5, %v32_v13 }
  0x26   :  { %37 = vst [vmem:[#allocation5 + $0x8] sm:$0xff] %v34_v14 }
  0x27   :  { %42 = vst.msk [vmem:[#allocation5 + $0x10] sm:$0x1] %vm40_vm0, %v35_v15 }
  0x28   :  { %99 = shalt.err (!%p96_p12)
}
  0x29   :  { %s100_s24 = scalar_lea.hbm %s151_s1, 272 }
  0x2a   :  { %p101_p13 = scmp.ne.s32.totalorder %s151_s1, %s100_s24  ;;  %p104_p0 = scmp.lt.u32.totalorder %s100_s24, %s151_s1 }
  0x2c   :  { %p106_p1 = pnand %p104_p0, %p101_p13 }
  0x2e   :  { %109 = shalt.err (!%p106_p1)
}
  0x2f   :  { %52 = dma.vmem_to_hbm [thread:$0]  %s50_s20, 272, %s151_s1, [#allocation4]  }
  0x30   :  { %112 = dma.done.wait [#allocation4], 272  }
  0x31   :  { %113 = vsyncadd [#allocation4], 4294967024 }
  0x32   :  { %56 = vsyncpa [#allocation3], 1 }
  0x33   :  { %57 = vsyncpa [#allocation4], 1 }

</bundles_post_ra>
